<compile_context>
chip_gen: v5e
topology: v5e:2x2
jax: 0.10.0
libtpu: 0.0.40
codegen_flags: <defaults>
</compile_context>

<pallas_src>
import functools

import jax
import jax.numpy as jnp
from jax import lax
from jax.experimental import pallas as pl
from jax.experimental.pallas import tpu as pltpu

# 1024 sublane-rows x 128 lanes = 131072 boxes per grid step.
# Blocks/step: 2 inputs x (4,1024,128) f32 = 4 MiB + (1024,128) f32 out = 0.5 MiB
# -> ~9 MiB double-buffered; fits 16 MiB (v5e) / 32 MiB (v6e, v7x) scoped VMEM.
_TILE_M_MAX = 1024


def _box_loss(p_ref, t_ref, loss_type):
    """Per-box IoU / GIoU loss on (tile_m, 128) component slabs."""
    px, py, pw, ph = p_ref[0], p_ref[1], p_ref[2], p_ref[3]
    tx, ty, tw, th = t_ref[0], t_ref[1], t_ref[2], t_ref[3]

    pw2, ph2 = pw * 0.5, ph * 0.5
    tw2, th2 = tw * 0.5, th * 0.5

    p_l, p_r = px - pw2, px + pw2
    p_t, p_b = py - ph2, py + ph2
    g_l, g_r = tx - tw2, tx + tw2
    g_t, g_b = ty - th2, ty + th2

    # intersection box
    tl_x = jnp.maximum(p_l, g_l)
    tl_y = jnp.maximum(p_t, g_t)
    br_x = jnp.minimum(p_r, g_r)
    br_y = jnp.minimum(p_b, g_b)

    area_p = pw * ph
    area_g = tw * th

    # en = prod over dims of (tl < br) cast to float == AND of both axes
    en = ((tl_x < br_x) & (tl_y < br_y)).astype(jnp.float32)
    area_i = (br_x - tl_x) * (br_y - tl_y) * en
    area_u = area_p + area_g - area_i
    iou = area_i / (area_u + 1e-16)

    if loss_type == "iou":
        return 1.0 - iou * iou
    elif loss_type == "giou":
        c_tl_x = jnp.minimum(p_l, g_l)
        c_tl_y = jnp.minimum(p_t, g_t)
        c_br_x = jnp.maximum(p_r, g_r)
        c_br_y = jnp.maximum(p_b, g_b)
        area_c = (c_br_x - c_tl_x) * (c_br_y - c_tl_y)
        giou = iou - (area_c - area_u) / jnp.maximum(area_c, 1e-16)
        return 1.0 - jnp.clip(giou, -1.0, 1.0)
    raise ValueError(f"unknown loss_type {loss_type!r}")


def _iou_loss_kernel(p_ref, t_ref, out_ref, *, loss_type):
    # p_ref/t_ref: (4, tile_m, 128) component-major; out_ref: (tile_m, 128)
    out_ref[...] = _box_loss(p_ref, t_ref, loss_type)


def _iou_loss_partial_sum_kernel(n_ref, p_ref, t_ref, out_ref, *, loss_type, tile_m):
    # n_ref: SMEM (1,) int32 true box count; out_ref: (8, 128) per-tile partial sum
    loss = _box_loss(p_ref, t_ref, loss_type)
    i = pl.program_id(0)
    rows = lax.broadcasted_iota(jnp.int32, (tile_m, 128), 0)
    lanes = lax.broadcasted_iota(jnp.int32, (tile_m, 128), 1)
    gidx = (i * tile_m + rows) * 128 + lanes          # global box index of each element
    loss = jnp.where(gidx < n_ref[0], loss, 0.0)      # mask padded boxes
    # (tile_m,128) -> (tile_m//8, 8, 128) is layout-preserving (sublane split)
    out_ref[...] = loss.reshape(tile_m // 8, 8, 128).sum(axis=0)


def _pad_and_slab(x, n_pad, m_pad):
    """(n,4) boxes -> component-major, lane/sublane-dense (4, m_pad, 128) slab."""
    n = x.shape[0]
    x = jnp.pad(x, ((0, n_pad - n), (0, 0)))          # (n_pad, 4); fuses under jit
    return x.T.reshape(4, m_pad, 128)                 # slab[c, r, l] = comp c of box r*128+l


def iou_loss(pred, target, *, loss_type="iou", reduction="none",
             tile_m_max=_TILE_M_MAX):
    """Pallas TPU implementation of YOLOX IOUloss.forward."""
    assert pred.shape[0] == target.shape[0]
    pred = pred.reshape(-1, 4).astype(jnp.float32)
    target = target.reshape(-1, 4).astype(jnp.float32)
    n = pred.shape[0]

    # number of 128-wide lane rows, rounded up to a multiple of 8 so every block
    # is a dense (8,128) vreg slab (no sublane-sparse vregs / masked stores)
    m = -(-max(n, 1) // 128)
    m = -(-m // 8) * 8
    if m > tile_m_max:
        tile_m = tile_m_max
        m_pad = -(-m // tile_m) * tile_m
    else:
        tile_m = m
        m_pad = m
    n_pad = m_pad * 128
    num_tiles = m_pad // tile_m

    p_slab = _pad_and_slab(pred, n_pad, m_pad)
    t_slab = _pad_and_slab(target, n_pad, m_pad)

    if reduction in ("mean", "sum"):
        # Fused reduction: per-tile masked partial sums; the full per-box loss
        # never round-trips through HBM.
        kernel = functools.partial(
            _iou_loss_partial_sum_kernel, loss_type=loss_type, tile_m=tile_m)
        partials = pl.pallas_call(
            kernel,
            out_shape=jax.ShapeDtypeStruct((num_tiles * 8, 128), jnp.float32),
            grid_spec=pltpu.PrefetchScalarGridSpec(
                num_scalar_prefetch=1,
                grid=(num_tiles,),
                in_specs=[
                    pl.BlockSpec((4, tile_m, 128), lambda i, n_ref: (0, i, 0)),
                    pl.BlockSpec((4, tile_m, 128), lambda i, n_ref: (0, i, 0)),
                ],
                out_specs=pl.BlockSpec((8, 128), lambda i, n_ref: (i, 0)),
            ),
            compiler_params=pltpu.CompilerParams(
                dimension_semantics=("parallel",),
            ),
        )(jnp.array([n], jnp.int32), p_slab, t_slab)
        total = partials.sum()
        if reduction == "mean":
            return total / n   # mirrors PyTorch: NaN for n == 0
        return total

    # reduction == "none" (or anything else, matching the PyTorch fall-through)
    kernel = functools.partial(_iou_loss_kernel, loss_type=loss_type)
    loss_2d = pl.pallas_call(
        kernel,
        out_shape=jax.ShapeDtypeStruct((m_pad, 128), jnp.float32),
        grid=(num_tiles,),
        in_specs=[
            pl.BlockSpec((4, tile_m, 128), lambda i: (0, i, 0)),
            pl.BlockSpec((4, tile_m, 128), lambda i: (0, i, 0)),
        ],
        out_specs=pl.BlockSpec((tile_m, 128), lambda i: (i, 0)),
        compiler_params=pltpu.CompilerParams(
            dimension_semantics=("parallel",),
        ),
    )(p_slab, t_slab)
    # padded lanes produce loss == 1.0; slice them off
    return loss_2d.reshape(-1)[:n]


def _iou_loss_ref(pred, target, *, loss_type="iou", reduction="none"):
    """Pure-JAX reference mirroring the PyTorch forward, for verification."""
    pred = pred.reshape(-1, 4).astype(jnp.float32)
    target = target.reshape(-1, 4).astype(jnp.float32)
    tl = jnp.maximum(pred[:, :2] - pred[:, 2:] / 2, target[:, :2] - target[:, 2:] / 2)
    br = jnp.minimum(pred[:, :2] + pred[:, 2:] / 2, target[:, :2] + target[:, 2:] / 2)
    area_p = jnp.prod(pred[:, 2:], axis=1)
    area_g = jnp.prod(target[:, 2:], axis=1)
    en = jnp.prod((tl < br).astype(jnp.float32), axis=1)
    area_i = jnp.prod(br - tl, axis=1) * en
    area_u = area_p + area_g - area_i
    iou = area_i / (area_u + 1e-16)
    if loss_type == "iou":
        loss = 1 - iou ** 2
    else:
        c_tl = jnp.minimum(pred[:, :2] - pred[:, 2:] / 2, target[:, :2] - target[:, 2:] / 2)
        c_br = jnp.maximum(pred[:, :2] + pred[:, 2:] / 2, target[:, :2] + target[:, 2:] / 2)
        area_c = jnp.prod(c_br - c_tl, axis=1)
        giou = iou - (area_c - area_u) / jnp.maximum(area_c, 1e-16)
        loss = 1 - jnp.clip(giou, -1.0, 1.0)
    if reduction == "mean":
        loss = loss.mean()
    elif reduction == "sum":
        loss = loss.sum()
    return loss


if __name__ == "__main__":
    iou_loss_jit = jax.jit(
        iou_loss, static_argnames=("loss_type", "reduction", "tile_m_max"))

    key = jax.random.PRNGKey(0)
    k1, k2, k3, k4 = jax.random.split(key, 4)
    n = 8  # number of boxes (cxcywh, positive widths/heights)

    pred = jnp.concatenate(
        [jax.random.uniform(k1, (n, 2), minval=0.0, maxval=10.0),
         jax.random.uniform(k2, (n, 2), minval=0.5, maxval=5.0)], axis=1)
    target = jnp.concatenate(
        [jax.random.uniform(k3, (n, 2), minval=0.0, maxval=10.0),
         jax.random.uniform(k4, (n, 2), minval=0.5, maxval=5.0)], axis=1)

    ok = True
    for loss_type in ("iou", "giou"):
        for reduction in ("none", "mean", "sum"):
            out = iou_loss_jit(pred, target, loss_type=loss_type, reduction=reduction)
            out = jax.block_until_ready(out)
            ref = _iou_loss_ref(pred, target, loss_type=loss_type, reduction=reduction)
            if not jnp.allclose(out, ref, atol=1e-5, rtol=1e-5):
                ok = False

    # also exercise a multi-tile path (grid > 1) with a small forced tile size
    kk1, kk2 = jax.random.split(k1)
    big_n = 2000  # m=16 rows; tile_m_max=8 -> grid of 2
    big_pred = jnp.concatenate(
        [jax.random.uniform(kk1, (big_n, 2), minval=0.0, maxval=10.0),
         jax.random.uniform(kk1, (big_n, 2), minval=0.5, maxval=5.0)], axis=1)
    big_tgt = jnp.concatenate(
        [jax.random.uniform(kk2, (big_n, 2), minval=0.0, maxval=10.0),
         jax.random.uniform(kk2, (big_n, 2), minval=0.5, maxval=5.0)], axis=1)
    for loss_type in ("iou", "giou"):
        for reduction in ("none", "sum", "mean"):
            out_big = jax.block_until_ready(
                iou_loss_jit(big_pred, big_tgt, loss_type=loss_type,
                             reduction=reduction, tile_m_max=8))
            ref_big = _iou_loss_ref(big_pred, big_tgt, loss_type=loss_type,
                                    reduction=reduction)
            if not jnp.allclose(out_big, ref_big, atol=1e-4, rtol=1e-5):
                ok = False

    if ok:
        print("KERNEL_OK")
    else:
        print("KERNEL_MISMATCH")
</pallas_src>

<mosaic_0001>
module attributes {stable_mosaic.version = 11 : i64} {
  func.func @_iou_loss_kernel(%arg0: i32, %arg1: memref<4x8x128xf32, #tpu.memory_space<vmem>>, %arg2: memref<4x8x128xf32, #tpu.memory_space<vmem>>, %arg3: memref<8x128xf32, #tpu.memory_space<vmem>>) attributes {dimension_semantics = [#tpu.dimension_semantics<parallel>], iteration_bounds = array<i64: 1>, scalar_prefetch = 0 : i64, scratch_operands = 0 : i64, tpu.core_type = #tpu.core_type<tc>, window_params = [{transform_indices = @transform_0, window_bounds = array<i64: 4, 8, 128>}, {transform_indices = @transform_1, window_bounds = array<i64: 4, 8, 128>}, {transform_indices = @transform_2, window_bounds = array<i64: 8, 128>}]} {
    %c0 = arith.constant 0 : index
    %c0_0 = arith.constant 0 : index
    %c0_1 = arith.constant 0 : index
    %0 = vector.load %arg1[%c0, %c0_0, %c0_1] : memref<4x8x128xf32, #tpu.memory_space<vmem>>, vector<1x8x128xf32>
    %1 = vector.shape_cast %0 : vector<1x8x128xf32> to vector<8x128xf32>
    %c1 = arith.constant 1 : index
    %c0_2 = arith.constant 0 : index
    %c0_3 = arith.constant 0 : index
    %2 = vector.load %arg1[%c1, %c0_2, %c0_3] : memref<4x8x128xf32, #tpu.memory_space<vmem>>, vector<1x8x128xf32>
    %3 = vector.shape_cast %2 : vector<1x8x128xf32> to vector<8x128xf32>
    %c2 = arith.constant 2 : index
    %c0_4 = arith.constant 0 : index
    %c0_5 = arith.constant 0 : index
    %4 = vector.load %arg1[%c2, %c0_4, %c0_5] : memref<4x8x128xf32, #tpu.memory_space<vmem>>, vector<1x8x128xf32>
    %5 = vector.shape_cast %4 : vector<1x8x128xf32> to vector<8x128xf32>
    %c3 = arith.constant 3 : index
    %c0_6 = arith.constant 0 : index
    %c0_7 = arith.constant 0 : index
    %6 = vector.load %arg1[%c3, %c0_6, %c0_7] : memref<4x8x128xf32, #tpu.memory_space<vmem>>, vector<1x8x128xf32>
    %7 = vector.shape_cast %6 : vector<1x8x128xf32> to vector<8x128xf32>
    %c0_8 = arith.constant 0 : index
    %c0_9 = arith.constant 0 : index
    %c0_10 = arith.constant 0 : index
    %8 = vector.load %arg2[%c0_8, %c0_9, %c0_10] : memref<4x8x128xf32, #tpu.memory_space<vmem>>, vector<1x8x128xf32>
    %9 = vector.shape_cast %8 : vector<1x8x128xf32> to vector<8x128xf32>
    %c1_11 = arith.constant 1 : index
    %c0_12 = arith.constant 0 : index
    %c0_13 = arith.constant 0 : index
    %10 = vector.load %arg2[%c1_11, %c0_12, %c0_13] : memref<4x8x128xf32, #tpu.memory_space<vmem>>, vector<1x8x128xf32>
    %11 = vector.shape_cast %10 : vector<1x8x128xf32> to vector<8x128xf32>
    %c2_14 = arith.constant 2 : index
    %c0_15 = arith.constant 0 : index
    %c0_16 = arith.constant 0 : index
    %12 = vector.load %arg2[%c2_14, %c0_15, %c0_16] : memref<4x8x128xf32, #tpu.memory_space<vmem>>, vector<1x8x128xf32>
    %13 = vector.shape_cast %12 : vector<1x8x128xf32> to vector<8x128xf32>
    %c3_17 = arith.constant 3 : index
    %c0_18 = arith.constant 0 : index
    %c0_19 = arith.constant 0 : index
    %14 = vector.load %arg2[%c3_17, %c0_18, %c0_19] : memref<4x8x128xf32, #tpu.memory_space<vmem>>, vector<1x8x128xf32>
    %15 = vector.shape_cast %14 : vector<1x8x128xf32> to vector<8x128xf32>
    %cst = arith.constant 5.000000e-01 : f32
    %16 = vector.broadcast %cst : f32 to vector<8x128xf32>
    %17 = arith.mulf %5, %16 : vector<8x128xf32>
    %cst_20 = arith.constant 5.000000e-01 : f32
    %18 = vector.broadcast %cst_20 : f32 to vector<8x128xf32>
    %19 = arith.mulf %7, %18 : vector<8x128xf32>
    %cst_21 = arith.constant 5.000000e-01 : f32
    %20 = vector.broadcast %cst_21 : f32 to vector<8x128xf32>
    %21 = arith.mulf %13, %20 : vector<8x128xf32>
    %cst_22 = arith.constant 5.000000e-01 : f32
    %22 = vector.broadcast %cst_22 : f32 to vector<8x128xf32>
    %23 = arith.mulf %15, %22 : vector<8x128xf32>
    %24 = arith.subf %1, %17 : vector<8x128xf32>
    %25 = arith.addf %1, %17 : vector<8x128xf32>
    %26 = arith.subf %3, %19 : vector<8x128xf32>
    %27 = arith.addf %3, %19 : vector<8x128xf32>
    %28 = arith.subf %9, %21 : vector<8x128xf32>
    %29 = arith.addf %9, %21 : vector<8x128xf32>
    %30 = arith.subf %11, %23 : vector<8x128xf32>
    %31 = arith.addf %11, %23 : vector<8x128xf32>
    %32 = arith.maximumf %24, %28 : vector<8x128xf32>
    %33 = arith.maximumf %26, %30 : vector<8x128xf32>
    %34 = arith.minimumf %25, %29 : vector<8x128xf32>
    %35 = arith.minimumf %27, %31 : vector<8x128xf32>
    %36 = arith.mulf %5, %7 : vector<8x128xf32>
    %37 = arith.mulf %13, %15 : vector<8x128xf32>
    %38 = arith.cmpf olt, %32, %34 : vector<8x128xf32>
    %39 = arith.cmpf olt, %33, %35 : vector<8x128xf32>
    %40 = arith.andi %38, %39 : vector<8x128xi1>
    %41 = arith.extui %40 : vector<8x128xi1> to vector<8x128xi32>
    %42 = arith.sitofp %41 : vector<8x128xi32> to vector<8x128xf32>
    %43 = arith.subf %34, %32 : vector<8x128xf32>
    %44 = arith.subf %35, %33 : vector<8x128xf32>
    %45 = arith.mulf %43, %44 : vector<8x128xf32>
    %46 = arith.mulf %45, %42 : vector<8x128xf32>
    %47 = arith.addf %36, %37 : vector<8x128xf32>
    %48 = arith.subf %47, %46 : vector<8x128xf32>
    %cst_23 = arith.constant 1.000000e-16 : f32
    %49 = vector.broadcast %cst_23 : f32 to vector<8x128xf32>
    %50 = arith.addf %48, %49 : vector<8x128xf32>
    %51 = arith.divf %46, %50 : vector<8x128xf32>
    %52 = arith.mulf %51, %51 : vector<8x128xf32>
    %cst_24 = arith.constant 1.000000e+00 : f32
    %53 = vector.broadcast %cst_24 : f32 to vector<8x128xf32>
    %54 = arith.subf %53, %52 : vector<8x128xf32>
    %c0_25 = arith.constant 0 : index
    %c0_26 = arith.constant 0 : index
    %55 = vector.load %arg3[%c0_25, %c0_26] : memref<8x128xf32, #tpu.memory_space<vmem>>, vector<8x128xf32>
    tpu.vector_store %arg3[%c0_25, %c0_26], %54 {strides = array<i32>} : memref<8x128xf32, #tpu.memory_space<vmem>>, vector<8x128xf32>,
    return
  }
  func.func @transform_0(%arg0: i32) -> (i32, i32, i32) {
    %c0_i32 = arith.constant 0 : i32
    %c0_i32_0 = arith.constant 0 : i32
    %c0_i32_1 = arith.constant 0 : i32
    return %c0_i32, %arg0, %c0_i32_0 : i32, i32, i32
  }
  func.func @transform_1(%arg0: i32) -> (i32, i32, i32) {
    %c0_i32 = arith.constant 0 : i32
    %c0_i32_0 = arith.constant 0 : i32
    %c0_i32_1 = arith.constant 0 : i32
    return %c0_i32, %arg0, %c0_i32_0 : i32, i32, i32
  }
  func.func @transform_2(%arg0: i32) -> (i32, i32) {
    %c0_i32 = arith.constant 0 : i32
    %c0_i32_0 = arith.constant 0 : i32
    return %arg0, %c0_i32 : i32, i32
  }
}

</mosaic_0001>

<bundles_post_ra>
// kernel: iou_loss.1
= control target key start
LH: loop header
LB: loop body
LE: loop exit
PB: predicated region body
PF: predicated region fallthrough
CT: control target
= control target key end

     0   :  { %v87_v28 = vmov 0.0   ;;  %s130_s0 = inlined_call_operand.vmem [shape: f32[4,8,128], index: 0, kind: input, shape index: {}]   ;;  %s131_s1 = inlined_call_operand.vmem [shape: f32[4,8,128], index: 1, kind: input, shape index: {}]   ;;  %s132_s2 = inlined_call_operand.vmem [shape: f32[8,128], index: 2, kind: output, shape index: {}]  }
   0x1   :  { %v11_v0 = vld [vmem:[%s130_s0] sm:$0xff]  ;;  %v78_v1 = vld [vmem:[%s130_s0 + $0x10] sm:$0xff]  ;;  %v77_v2 = vld [vmem:[%s130_s0 + $0x8] sm:$0xff] }
   0x2   :  { %v79_v3 = vld [vmem:[%s130_s0 + $0x18] sm:$0xff]  ;;  %v18_v4 = vld [vmem:[%s131_s1] sm:$0xff]  ;;  %v25_v5 = vmul.f32 0.5, %v78_v1  ;;  %v80_v6 = vld [vmem:[%s131_s1 + $0x8] sm:$0xff] }
   0x3   :  { %v81_v7 = vld [vmem:[%s131_s1 + $0x10] sm:$0xff]  ;;  %v82_v8 = vld [vmem:[%s131_s1 + $0x18] sm:$0xff]  ;;  %v26_v9 = vmul.f32 0.5, %v79_v3  ;;  %v41_v20 = vmul.f32 %v79_v3, %v78_v1 }
   0x4   :  { %v27_v10 = vmul.f32 0.5, %v81_v7  ;;  %v28_v11 = vmul.f32 0.5, %v82_v8  ;;  %v29_v12 = vsub.f32 %v11_v0, %v25_v5  ;;  %v30_v13 = vadd.f32 %v25_v5, %v11_v0 }
   0x5   :  { %v31_v14 = vsub.f32 %v77_v2, %v26_v9  ;;  %v32_v15 = vadd.f32 %v77_v2, %v26_v9  ;;  %v42_v21 = vmul.f32 %v82_v8, %v81_v7 }
   0x6   :  { %v33_v16 = vsub.f32 %v18_v4, %v27_v10  ;;  %v34_v17 = vadd.f32 %v27_v10, %v18_v4  ;;  %v35_v18 = vsub.f32 %v80_v6, %v28_v11  ;;  %v36_v19 = vadd.f32 %v80_v6, %v28_v11 }
   0x7   :  { %v52_v31 = vadd.f32 %v42_v21, %v41_v20 }
   0x8   :  { %v37_v22 = vmax.f32 %v29_v12, %v33_v16  ;;  %v38_v23 = vmax.f32 %v31_v14, %v35_v18  ;;  %v39_v24 = vmin.f32 %v30_v13, %v34_v17  ;;  %v40_v25 = vmin.f32 %v32_v15, %v36_v19 }
   0xa   :  { %vm43_vm0 = vcmp.lt.f32.partialorder %v37_v22, %v39_v24  ;;  %vm44_vm1 = vcmp.lt.f32.partialorder %v38_v23, %v40_v25  ;;  %v48_v26 = vsub.f32 %v39_v24, %v37_v22  ;;  %v49_v27 = vsub.f32 %v40_v25, %v38_v23 }
   0xb   :  { %vm45_vm2 = vmand %vm43_vm0, %vm44_vm1 }
   0xc   :  { %v83_v29 = vsel %vm45_vm2, 1.0, %v87_v28  ;;  %v50_v30 = vmul.f32 %v49_v27, %v48_v26 }
   0xe   :  { %v51_v32 = vmul.f32 %v83_v29, %v50_v30 }
  0x10   :  { %v53_v33 = vsub.f32 %v52_v31, %v51_v32 }
  0x12   :  { %v54_v34 = vadd.f32 1e-16, %v53_v33 }
  0x14   :  { %85 = vrcp.f32 %v54_v34  ;;  %v66_v37 = vand.u32 2147483648, %v54_v34  ;;  %vm60_vm3 = vweird.f32 %v54_v34  ;;  %v64_v39 = vand.u32 2147483647, %v54_v34 }
  0x16   :  { %v67_v41 = vor.u32 1.1754944e-38, %v66_v37  ;;  %vm65_vm6 = vcmp.eq.f32.partialorder %v64_v39, 8.507059e+37 }
  0x1a   :  { %v86_v35 = vpop.eup %85 }
  0x1b   :  { %v56_v36 = vmul.f32 %v86_v35, %v54_v34  ;;  %vm61_vm4 = vweird.f32 %v86_v35 }
  0x1c   :  { %vm62_vm5 = vmor %vm60_vm3, %vm61_vm4 }
  0x1d   :  { %v57_v38 = vsub.f32 1.0, %v56_v36 }
  0x1f   :  { %v58_v40 = vmul.f32 %v86_v35, %v57_v38 }
  0x21   :  { %v59_v42 = vadd.f32 %v86_v35, %v58_v40 }
  0x23   :  { %v63_v43 = vsel %vm62_vm5, %v86_v35, %v59_v42 }
  0x24   :  { %v68_v44 = vsel %vm65_vm6, %v67_v41, %v63_v43 }
  0x25   :  { %v69_v45 = vmul.f32 %v68_v44, %v51_v32 }
  0x27   :  { %v70_v46 = vmul.f32 %v69_v45, %v69_v45 }
  0x29   :  { %v71_v47 = vsub.f32 1.0, %v70_v46 }
  0x2b   :  { %72 = vst [vmem:[%s132_s2] sm:$0xff] %v71_v47 }

</bundles_post_ra>
